<compile_context>
chip_gen: v7x
topology: tpu7x:2x2x1
jax: 0.10.0
libtpu: 0.0.40
codegen_flags: <defaults>
</compile_context>

<pallas_src>
import functools

import jax
import jax.numpy as jnp
from jax.experimental import pallas as pl
from jax.experimental.pallas import tpu as pltpu

LANES = 128
SUBLANES = 8
NCORES = 2  # v7x has 2 TensorCores; on v5e/v6e this axis simply iterates.


def _round_up(x, m):
    return ((x + m - 1) // m) * m


def _mse_kernel(x_ref, t_ref, o_ref, *, tile_rows, rows, steps_per_core):
    c = pl.program_id(0)   # core-split axis ("parallel")
    i = pl.program_id(1)   # row-block axis ("arbitrary", reduction)

    @pl.when(i == 0)
    def _():
        o_ref[...] = jnp.zeros_like(o_ref)

    d = x_ref[...].astype(jnp.float32) - t_ref[...].astype(jnp.float32)

    # Mask rows past the true row count: covers the overhang of the last real
    # block and the phantom (clamped) steps of the second core.
    row0 = (c * steps_per_core + i) * tile_rows
    row_ids = jax.lax.broadcasted_iota(jnp.int32, (tile_rows, 1), 0) + row0
    d = jnp.where(row_ids < rows, d, 0.0)

    sq = d * d
    # Pure-VPU partial reduction: collapse (tile_rows, 128) onto the resident
    # (8, 128) output block by summing whole (8,128) vreg tiles.
    o_ref[...] += jnp.sum(
        sq.reshape(tile_rows // SUBLANES, SUBLANES, LANES), axis=0
    )


def content_loss(x, target, *, tile_rows=2048):
    """Pallas equivalent of ContentLoss.forward: scalar MSE(input, target)."""
    assert x.shape == target.shape, "input/target shape mismatch"
    total = x.size

    xf = x.reshape(-1)
    tf = target.reshape(-1)

    # Fallback only: if the element count is not a multiple of 8*128, pad both
    # arrays identically with zeros (zero diff -> no contribution).  The mean
    # divisor always uses the true element count.
    padded_total = _round_up(total, LANES * SUBLANES)
    if padded_total != total:
        pad = padded_total - total
        xf = jnp.pad(xf, (0, pad))
        tf = jnp.pad(tf, (0, pad))

    rows = padded_total // LANES          # multiple of 8
    x2 = xf.reshape(rows, LANES)          # native dtype; cast happens in-kernel
    t2 = tf.reshape(rows, LANES)

    tile_rows = max(SUBLANES, _round_up(tile_rows, SUBLANES))
    tile_rows = min(tile_rows, rows)

    num_blocks = pl.cdiv(rows, tile_rows)
    steps_per_core = pl.cdiv(num_blocks, NCORES)

    def in_map(c, i):
        # Clamp phantom steps of the second core to a valid block; their
        # contribution is zeroed by the in-kernel row mask.
        return (jnp.minimum(c * steps_per_core + i, num_blocks - 1), 0)

    kernel = functools.partial(
        _mse_kernel, tile_rows=tile_rows, rows=rows, steps_per_core=steps_per_core
    )

    partials = pl.pallas_call(
        kernel,
        out_shape=jax.ShapeDtypeStruct((NCORES * SUBLANES, LANES), jnp.float32),
        grid=(NCORES, steps_per_core),
        in_specs=[
            pl.BlockSpec((tile_rows, LANES), in_map),
            pl.BlockSpec((tile_rows, LANES), in_map),
        ],
        out_specs=pl.BlockSpec((SUBLANES, LANES), lambda c, i: (c, 0)),
        compiler_params=pltpu.CompilerParams(
            dimension_semantics=("parallel", "arbitrary"),
        ),
    )(x2, t2)

    # Tiny final reduction + mean divisor (true element count) in the wrapper.
    return jnp.sum(partials) / jnp.float32(total)


if __name__ == "__main__":
    key = jax.random.PRNGKey(0)
    k_in, k_tgt = jax.random.split(key)

    # Small NCHW shapes: batch=2, channels=4, spatial=16x16.
    shape = (2, 4, 16, 16)
    x = jax.random.normal(k_in, shape, dtype=jnp.float32)
    # target acts as a detached constant (mirrors .detach() in the module).
    target = jax.random.normal(k_tgt, shape, dtype=jnp.float32)

    loss = content_loss(x, target)
    jax.block_until_ready(loss)

    # Reference: F.mse_loss default 'mean' reduction.
    ref = jnp.mean((x - target) ** 2)
    assert jnp.allclose(loss, ref, rtol=1e-6, atol=1e-6), (loss, ref)

    print("KERNEL_OK")
</pallas_src>

<mosaic_0001>
module attributes {stable_mosaic.version = 11 : i64} {
  func.func @_mse_kernel(%arg0: i32, %arg1: i32, %arg2: memref<16x128xf32, #tpu.memory_space<vmem>>, %arg3: memref<16x128xf32, #tpu.memory_space<vmem>>, %arg4: memref<8x128xf32, #tpu.memory_space<vmem>>) attributes {dimension_semantics = [#tpu.dimension_semantics<parallel>, #tpu.dimension_semantics<arbitrary>], iteration_bounds = array<i64: 2, 1>, scalar_prefetch = 0 : i64, scratch_operands = 0 : i64, tpu.core_type = #tpu.core_type<tc>, window_params = [{transform_indices = @transform_0, window_bounds = array<i64: 16, 128>}, {transform_indices = @transform_1, window_bounds = array<i64: 16, 128>}, {transform_indices = @transform_2, window_bounds = array<i64: 8, 128>}]} {
    %c0_i32 = arith.constant 0 : i32
    %0 = arith.cmpi eq, %arg1, %c0_i32 : i32
    %1 = arith.extui %0 : i1 to i32
    %c0_i32_0 = arith.constant 0 : i32
    %2 = arith.cmpi ne, %1, %c0_i32_0 : i32
    scf.if %2 {
      %cst_10 = arith.constant 0.000000e+00 : f32
      %24 = vector.broadcast %cst_10 : f32 to vector<8x128xf32>
      %c0_11 = arith.constant 0 : index
      %c0_12 = arith.constant 0 : index
      %25 = vector.load %arg4[%c0_11, %c0_12] : memref<8x128xf32, #tpu.memory_space<vmem>>, vector<8x128xf32>
      tpu.vector_store %arg4[%c0_11, %c0_12], %24 {strides = array<i32>} : memref<8x128xf32, #tpu.memory_space<vmem>>, vector<8x128xf32>,
    } else {
    }
    %c0 = arith.constant 0 : index
    %c0_1 = arith.constant 0 : index
    %3 = vector.load %arg2[%c0, %c0_1] : memref<16x128xf32, #tpu.memory_space<vmem>>, vector<16x128xf32>
    %c0_2 = arith.constant 0 : index
    %c0_3 = arith.constant 0 : index
    %4 = vector.load %arg3[%c0_2, %c0_3] : memref<16x128xf32, #tpu.memory_space<vmem>>, vector<16x128xf32>
    %5 = arith.subf %3, %4 : vector<16x128xf32>
    %c1_i32 = arith.constant 1 : i32
    %6 = arith.muli %arg0, %c1_i32 : i32
    %7 = arith.addi %6, %arg1 : i32
    %c16_i32 = arith.constant 16 : i32
    %8 = arith.muli %7, %c16_i32 : i32
    %9 = tpu.iota {dimensions = array<i32: 0>} : vector<16x1xi32>
    %10 = vector.broadcast %8 : i32 to vector<16x1xi32>
    %11 = arith.addi %9, %10 : vector<16x1xi32>
    %c16_i32_4 = arith.constant 16 : i32
    %12 = vector.broadcast %c16_i32_4 : i32 to vector<16x1xi32>
    %13 = arith.cmpi slt, %11, %12 : vector<16x1xi32>
    %cst = arith.constant 0.000000e+00 : f32
    %14 = vector.shape_cast %13 : vector<16x1xi1> to vector<16x1xi1>
    %15 = vector.broadcast %14 : vector<16x1xi1> to vector<16x128xi1>
    %16 = vector.broadcast %cst : f32 to vector<16x128xf32>
    %17 = arith.select %15, %5, %16 : vector<16x128xi1>, vector<16x128xf32>
    %18 = arith.mulf %17, %17 : vector<16x128xf32>
    %c0_5 = arith.constant 0 : index
    %c0_6 = arith.constant 0 : index
    %19 = vector.load %arg4[%c0_5, %c0_6] : memref<8x128xf32, #tpu.memory_space<vmem>>, vector<8x128xf32>
    %20 = vector.shape_cast %18 : vector<16x128xf32> to vector<2x8x128xf32>
    %cst_7 = arith.constant dense<0.000000e+00> : vector<8x128xf32>
    %21 = vector.multi_reduction <add>, %20, %cst_7 [0] : vector<2x8x128xf32> to vector<8x128xf32>
    %22 = arith.addf %19, %21 : vector<8x128xf32>
    %c0_8 = arith.constant 0 : index
    %c0_9 = arith.constant 0 : index
    %23 = vector.load %arg4[%c0_8, %c0_9] : memref<8x128xf32, #tpu.memory_space<vmem>>, vector<8x128xf32>
    tpu.vector_store %arg4[%c0_8, %c0_9], %22 {strides = array<i32>} : memref<8x128xf32, #tpu.memory_space<vmem>>, vector<8x128xf32>,
    return
  }
  func.func @transform_0(%arg0: i32, %arg1: i32) -> (i32, i32) {
    %c1_i32 = arith.constant 1 : i32
    %0 = arith.muli %arg0, %c1_i32 : i32
    %1 = arith.addi %0, %arg1 : i32
    %c0_i32 = arith.constant 0 : i32
    %2 = arith.minsi %1, %c0_i32 : i32
    %c0_i32_0 = arith.constant 0 : i32
    %c0_i32_1 = arith.constant 0 : i32
    return %2, %c0_i32_0 : i32, i32
  }
  func.func @transform_1(%arg0: i32, %arg1: i32) -> (i32, i32) {
    %c1_i32 = arith.constant 1 : i32
    %0 = arith.muli %arg0, %c1_i32 : i32
    %1 = arith.addi %0, %arg1 : i32
    %c0_i32 = arith.constant 0 : i32
    %2 = arith.minsi %1, %c0_i32 : i32
    %c0_i32_0 = arith.constant 0 : i32
    %c0_i32_1 = arith.constant 0 : i32
    return %2, %c0_i32_0 : i32, i32
  }
  func.func @transform_2(%arg0: i32, %arg1: i32) -> (i32, i32) {
    %c0_i32 = arith.constant 0 : i32
    %c0_i32_0 = arith.constant 0 : i32
    return %arg0, %c0_i32 : i32, i32
  }
}

</mosaic_0001>

<bundles_post_ra>
// kernel: tpu_custom_call.1
= control target key start
LH: loop header
LB: loop body
LE: loop exit
PB: predicated region body
PF: predicated region fallthrough
CT: control target
= control target key end

     0   :  { %7 = vsyncpa [#allocation3], 0  ;;  %s896_s0 = inlined_call_operand.hbm [shape: f32[16,128], index: 0, kind: input, shape index: {}]   ;;  %s897_s1 = inlined_call_operand.hbm [shape: f32[16,128], index: 1, kind: input, shape index: {}]   ;;  %s898_s2 = inlined_call_operand.hbm [shape: f32[16,128], index: 2, kind: output, shape index: {}]  }
   0x1   :  { %9 = vsyncpa [#allocation3 + $0x1], 0 }
   0x2   :  { %10 = vsyncpa [#allocation6], 0 }
   0x3   :  { %12 = vsyncpa [#allocation6 + $0x1], 0 }
   0x4   :  { %13 = vsyncpa [#allocation4], 0 }
   0x5   :  { %15 = vsyncpa [#allocation4 + $0x1], 0  ;;  %s692_s9 = smov 0   ;;  %s694_s10 = smov 0  }
   0x6   :  { %s696_s11 = smov 0   ;;  %s698_s12 = smov 0  }
   0x7   :  { %s700_s13 = smov 0   ;;  %s702_s14 = smov 0  }
   0x8   :  { %s704_s15 = smov 0   ;;  %s706_s16 = smov 0  }
   0x9 LB: > { %s388_s17 = sadd.s32 4294967295, %s670_s16   ;;  %s389_s18 = sadd.s32 4294967294, %s670_s16   ;;  %s670_s16 = sphi %s706_s16, %s21_s16   ;;  %s666_s15 = sphi %s704_s15, %s917_s15   ;;  %s662_s14 = sphi %s702_s14, %s916_s14   ;;  %s658_s13 = sphi %s700_s13, %s886_s13   ;;  %s654_s12 = sphi %s698_s12, %s915_s12   ;;  %s650_s11 = sphi %s696_s11, %s914_s11   ;;  %s646_s10 = sphi %s694_s10, %s913_s10   ;;  %s642_s9 = sphi %s692_s9, %s912_s9  }
   0xa   : > { %s33_s19 = sadd.s32 1, %s666_s15  ;;  %p639_p1 = scmp.ne.s32.totalorder %s658_s13, 0 }
   0xb   : > { %p35_p0 = scmp.ge.s32.totalorder %s33_s19, 2  ;;  %p54_p2 = scmp.eq.s32.totalorder %s670_s16, 0 }
   0xc   : > { %p59_p3 = scmp.ne.s32.totalorder %s658_s13, %s654_s12  ;;  %p60_p5 = scmp.eq.s32.totalorder %s388_s17, 0 }
   0xd   : > { %s919_s19 = smov (%p35_p0, %s33_s19), 0  ;;  %p738_p4 = por %p639_p1, %p54_p2 }
   0xe   : > { %p742_p6 = por %p60_p5, %p59_p3  ;;  %s101_s22 = ssub.s32 %s666_s15, %s919_s19 }
   0xf   : > { %p102_p7 = scmp.eq.s32.totalorder %s101_s22, 0  ;;  %s104_s23 = sadd.s32 1, %s650_s11 }
  0x10   : > { %s902_s21 = scalar_select %p742_p6, 1, 0 }
  0x11   : > { %s750_s24 = scalar_select %p102_p7, %s650_s11, %s104_s23  }
  0x12   : > { %p114_p8 = scmp.ne.s32.totalorder %s650_s11, %s646_s10  ;;  %p115_p9 = scmp.eq.s32.totalorder %s388_s17, 1 }
  0x13   : > { %p120_p10 = scmp.ne.s32.totalorder %s646_s10, %s642_s9  ;;  %p121_p11 = scmp.eq.s32.totalorder %s389_s18, 1 }
  0x14   : > { %p756_p12 = por %p115_p9, %p114_p8  ;;  %p426_p1 = scmp.lt.s32.totalorder %s670_s16, 2 }
  0x15   : > { %p761_p0 = por %p121_p11, %p120_p10  ;;  %s672_s27 = smov [#allocation2]  }
  0x16   : > { %s903_s25 = scalar_select %p756_p12, 1, 0 }
  0x17   : > { %s904_s26 = scalar_select %p761_p0, 1, 0 }
  0x18   : > { %s155_s28 = sshll.u32 %s672_s27, 4  ;;  %p768_p2 = pnand %p426_p1, %p738_p4  ;;  %s156_s28 = int_to_ptr.vmem [resolvable:$true] %s155_s28 }
  0x19   : > { %s503_s4 = scalar_lea.hbm %s896_s0, 256 }
  0x1a   : > { %p504_p3 = scmp.ne.s32.totalorder %s896_s0, %s503_s4  ;;  %p505_p5 = pneg %p768_p2 }
  0x1b   : > { %p510_p8 = scmp.lt.u32.totalorder %s503_s4, %s503_s4  ;;  %p512_p9 = scmp.lt.u32.totalorder %s503_s4, %s896_s0 }
  0x1c   : > { %p506_p7 = pnand %p505_p5, %p504_p3 }
  0x1d   : > { %p513_p10 = por %p512_p9, %p510_p8 }
  0x1e   : > { %p507_p4 = pneg %p506_p7 }
  0x20   : > { %p514_p11 = pnand %p513_p10, %p507_p4 }
  0x22   : > { %517 = shalt.err (!%p514_p11)
}
  0x23   : > { %s518_s12 = scalar_lea.vmem %s156_s28, 256  ;;  %s525_s17 = scalar_lea.vmem %s156_s28, 512 }
  0x24   : > { %p519_p1 = scmp.ne.s32.totalorder %s156_s28, %s518_s12  ;;  %p526_p12 = scmp.lt.s32.totalorder %s156_s28, %s156_s28 }
  0x25   : > { %p527_p6 = scmp.lt.s32.totalorder %s525_s17, %s518_s12 }
  0x26   : > { %p521_p13 = pnand %p519_p1, %p505_p5 }
  0x27   : > { %p528_p3 = por %p527_p6, %p526_p12 }
  0x28   : > { %p522_p0 = pneg %p521_p13 }
  0x2a   : > { %p529_p7 = pnand %p528_p3, %p522_p0 }
  0x2c   : > { %532 = shalt.err (!%p529_p7)
}
  0x2d   : > { %s673_s18 = smov 128   ;;  %s674_s20 = smov 8  }
  0x2e   : > { %418 = dma.hbm_to_vmem [thread:$0]  (!%p768_p2), %s896_s0, 256, %s156_s28, [#allocation3], %s673_s18, %s673_s18, %s674_s20  }
  0x2f   : > { %p398_p13 = scmp.ge.s32.totalorder %s670_s16, 1  ;;  %p187_p4 = scmp.lt.s32.totalorder %s670_s16, 3 }
  0x30   : > { %s675_s30 = smov [#allocation5]   ;;  %s533_s6 = scalar_lea.hbm %s897_s1, 256 }
  0x31   : > { %p799_p8 = pnand %p398_p13, %p187_p4  ;;  %s179_s3 = sshll.u32 %s675_s30, 4  ;;  %s180_s3 = int_to_ptr.vmem [resolvable:$true] %s179_s3 }
  0x32   : > { %p534_p6 = scmp.ne.s32.totalorder %s897_s1, %s533_s6  ;;  %p540_p9 = scmp.lt.u32.totalorder %s533_s6, %s533_s6 }
  0x33   : > { %s906_s27 = scalar_select %p799_p8, 1, 0 }
  0x34   : > { %p536_p12 = pnand %p534_p6, %p505_p5  ;;  %p542_p10 = scmp.lt.u32.totalorder %s533_s6, %s897_s1 }
  0x36   : > { %p537_p0 = pneg %p536_p12  ;;  %p543_p11 = por %p542_p10, %p540_p9 }
  0x38   : > { %p544_p1 = pnand %p543_p11, %p537_p0 }
  0x3a   : > { %547 = shalt.err (!%p544_p1)
}
  0x3b   : > { %s548_s17 = scalar_lea.vmem %s180_s3, 256  ;;  %s555_s22 = scalar_lea.vmem %s180_s3, 512 }
  0x3c   : > { %p549_p3 = scmp.ne.s32.totalorder %s180_s3, %s548_s17  ;;  %p556_p4 = scmp.lt.s32.totalorder %s180_s3, %s180_s3 }
  0x3d   : > { %p557_p8 = scmp.lt.s32.totalorder %s555_s22, %s548_s17 }
  0x3e   : > { %p551_p7 = pnand %p549_p3, %p505_p5 }
  0x3f   : > { %p558_p6 = por %p557_p8, %p556_p4 }
  0x40   : > { %p552_p13 = pneg %p551_p7 }
  0x42   : > { %p559_p12 = pnand %p558_p6, %p552_p13 }
  0x44   : > { %562 = shalt.err (!%p559_p12)
}
  0x45   : > { %421 = dma.hbm_to_vmem [thread:$0]  (!%p768_p2), %s897_s1, 256, %s180_s3, [#allocation6], %s673_s18, %s673_s18, %s674_s20  }
  0x46   : > { %p907_p0 = scmp.ne.s32.totalorder %s906_s27, 0 }
  0x47   : > { %s193_s4 = sand.u32 (!%p907_p0), 1, %s658_s13   ;;  %p908_p5 = scmp.ne.s32.totalorder (!%p907_p0), %s902_s21, 0 }
  0x48   : > { %191 = sbr.rel (%p907_p0) target bundleno = 110 (0x6e), region = 28  ;;  %s399_s5 = sshll.u32 (!%p907_p0), %s193_s4, 4 }
  0x49   : > { %s194_s6 = scalar_lea.sflag (!%p907_p0), [#allocation3], %s193_s4  ;;  %s197_s7 = scalar_lea.vmem (!%p907_p0), [#allocation2], %s399_s5 }
  0x4f   : > { %628 = dma.done.wait (%p908_p5), %s194_s6, 256  }
  0x50   : > { %630 = vsyncadd (%p908_p5), %s194_s6, 4294967040  ;;  %s203_s29 = scalar_lea.sflag [#allocation6], %s193_s4  ;;  %s206_s8 = scalar_lea.vmem [#allocation5], %s399_s5 }
  0x51   : > { %632 = dma.done.wait (%p908_p5), %s203_s29, 256  }
  0x52   : > { %634 = vsyncadd (%p908_p5), %s203_s29, 4294967040  ;;  %s402_s18 = sshll.u32 %s662_s14, 4  ;;  %v253_v0 = vlaneseq  ;;  %s229_s20 = sand.u32 1, %s646_s10   ;;  %v245_v6 = vld [vmem:[%s197_s7] sm:$0xff]  ;;  %v246_v7 = vld [vmem:[%s197_s7 + $0x8] sm:$0xff] }
  0x53   : > { %v256_v1 = vstv %s402_s18  ;;  %s401_s27 = sshll.u32 %s229_s20, 3  ;;  %v247_v8 = vld [vmem:[%s206_s8] sm:$0xff]  ;;  %v248_v9 = vld [vmem:[%s206_s8 + $0x8] sm:$0xff]  ;;  %s404_s21 = sshll.u32 %s662_s14, 7 }
  0x54   : > { %v254_v2 = vshrl.u32 %v253_v0, 7  ;;  %v249_v10 = vsub.f32 %v245_v6, %v247_v8  ;;  %v250_v11 = vsub.f32 %v246_v7, %v248_v9  ;;  %s231_s3 = scalar_lea.vmem [#allocation7], %s401_s27  ;;  %s843_s22 = scalar_lea.hbm %s898_s2, %s404_s21 }
  0x55   : > { %s287_s28 = sshll.u32 %s231_s3, 4  ;;  %s274_s23 = scalar_lea.sflag [#allocation4], %s229_s20  ;;  %s845_s28 = int_to_ptr.vmem [resolvable:$true] %s287_s28 }
  0x56   : > { %v255_v3 = vadd.s32 8, %v254_v2  ;;  %v257_v4 = vadd.s32 %v256_v1, %v254_v2  ;;  %s563_s30 = scalar_lea.vmem %s845_s28, 128  ;;  %p909_p8 = scmp.ne.s32.totalorder %s903_s25, 0 }
  0x57   : > { %p564_p2 = scmp.ne.s32.totalorder %s845_s28, %s563_s30  ;;  %s676_s14 = smov [#allocation7]  }
  0x58   : > { %v258_v5 = vadd.s32 %v256_v1, %v255_v3  ;;  %vm259_vm0 = vcmp.lt.s32.totalorder %v257_v4, 16  ;;  %s567_s4 = sshll.u32 %s676_s14, 4  ;;  %s568_s4 = int_to_ptr.vmem [resolvable:$false] %s567_s4 }
  0x59   : > { %v265_v12 = vsel %vm259_vm0, %v249_v10, 0.0  ;;  %p565_p9 = pnand %p564_p2, %p909_p8  ;;  %s569_s5 = scalar_lea.vmem %s568_s4, 256 }
  0x5a   : > { %vm260_vm1 = vcmp.lt.s32.totalorder %v258_v5, 16  ;;  %v267_v14 = vmul.f32 %v265_v12, %v265_v12  ;;  %p570_p11 = scmp.lt.s32.totalorder %s845_s28, %s568_s4  ;;  %p571_p1 = scmp.lt.s32.totalorder %s569_s5, %s563_s30 }
  0x5b   : > { %v266_v13 = vsel %vm260_vm1, %v250_v11, 0.0  ;;  %p566_p10 = pneg %p565_p9 }
  0x5c   : > { %v268_v15 = vmul.f32 %v266_v13, %v266_v13  ;;  %p572_p3 = por %p571_p1, %p570_p11 }
  0x5e   : > { %v270_v16 = vadd.f32 %v268_v15, %v267_v14  ;;  %p573_p7 = pnand %p572_p3, %p566_p10 }
  0x60   : > { %272 = vst [vmem:[%s231_s3] sm:$0xff] %v270_v16 }
  0x61   : > { %576 = shalt.err (!%p573_p7)
}
  0x62   : > { %s577_s6 = scalar_lea.hbm %s843_s22, 128  ;;  %s581_s8 = scalar_lea.hbm %s898_s2, 256 }
  0x63   : > { %p578_p13 = scmp.ne.s32.totalorder %s843_s22, %s577_s6  ;;  %p582_p12 = scmp.lt.u32.totalorder %s843_s22, %s898_s2 }
  0x64   : > { %p583_p0 = scmp.lt.u32.totalorder %s581_s8, %s577_s6  ;;  %p585_p2 = scmp.lt.u32.totalorder %s577_s6, %s843_s22 }
  0x65   : > { %p579_p4 = pnand %p578_p13, %p909_p8 }
  0x66   : > { %p584_p5 = por %p583_p0, %p582_p12 }
  0x67   : > { %p580_p6 = pneg %p579_p4 }
  0x68   : > { %p586_p9 = por %p585_p2, %p584_p5 }
  0x6a   : > { %p587_p10 = pnand %p586_p9, %p580_p6 }
  0x6c   : > { %590 = shalt.err (!%p587_p10)
}
  0x6d   : > { %413 = dma.vmem_to_hbm [thread:$0]  (%p909_p8), %s845_s28, 128, %s843_s22, %s274_s23  }
  0x6e PF: > { %s299_s27 = sand.u32 1, %s642_s9   ;;  %p910_p11 = scmp.ne.s32.totalorder %s904_s26, 0 }
  0x6f   : > { %p911_p1 = scmp.ge.s32.totalorder %s670_s16, 2  ;;  %s300_s21 = scalar_lea.sflag [#allocation4], %s299_s27 }
  0x71   : > { %p423_p3 = pnand %p911_p1, %p910_p11 }
  0x73   : > { %636 = dma.done.wait (!%p423_p3), %s300_s21, 128  }
  0x74   : > { %638 = vsyncadd (!%p423_p3), %s300_s21, 4294967168  ;;  %s21_s16 = sadd.s32 1, %s670_s16   ;;  %s912_s9 = smov %s646_s10 }
  0x75   : > { %p18_p7 = scmp.ge.s32.totalorder %s21_s16, 4   ;;  %s913_s10 = smov %s650_s11 }
  0x76   : > { %s914_s11 = smov %s750_s24  ;;  %s915_s12 = smov %s658_s13 }
  0x77   : > { %s886_s13 = smov 0   ;;  %s916_s14 = smov %s666_s15 }
  0x78   : > { %s917_s15 = smov %s919_s19  ;;  %20 = sbr.rel (!%p18_p7) target bundleno = 9 (0x9), region = 90 }
  0x7f   :  { %305 = vsyncpa [#allocation3], 1 }
  0x80   :  { %307 = vsyncpa [#allocation3 + $0x1], 1 }
  0x81   :  { %308 = vsyncpa [#allocation6], 1 }
  0x82   :  { %310 = vsyncpa [#allocation6 + $0x1], 1 }
  0x83   :  { %311 = vsyncpa [#allocation4], 1 }
  0x84   :  { %313 = vsyncpa [#allocation4 + $0x1], 1 }

</bundles_post_ra>
